<compile_context>
chip_gen: v5e
topology: v5e:2x2
jax: 0.10.0
libtpu: 0.0.40
codegen_flags: <defaults>
</compile_context>

<pallas_src>
import functools

import numpy as np
import jax
import jax.numpy as jnp
from jax import lax
from jax.experimental import pallas as pl
from jax.experimental.pallas import tpu as pltpu

_LANE = 128
_SUBLANE = 8
_SLAB = 512                      # rows per inner accumulation slab (multiple of 8)
_BLOCK_ROW_BUDGET = 8192         # ~4 MiB of f32 (128-lane rows) per input per buffer
_EPS = 1e-8
# ITU-R BT.601 luma coefficients with the /255 folded in (+16 offsets cancel
# in pred_Y - target_Y, so they never need to be applied).
_Y_COEF = (65.481 / 255.0, 128.553 / 255.0, 24.966 / 255.0)


def _round_up(x, m):
    return -(-x // m) * m


def _round_down(x, m):
    return (x // m) * m


def _sqdiff_sum_kernel(pred_ref, target_ref, out_ref, acc_ref, *,
                       nch, coef, rows, chunk_rows, nk, slab_rows, needs_mask):
    """Accumulates per-sample sum of squared (Y-)diff over the k (row-chunk) axis.

    pred_ref/target_ref : VMEM (tb, nch, chunk_rows, 128)
    out_ref             : VMEM (1, 1, tb, 128), resident across the k axis
    acc_ref             : VMEM (tb, 128) f32 accumulator scratch
    """
    k = pl.program_id(2)

    @pl.when(k == 0)
    def _init():
        acc_ref[...] = jnp.zeros_like(acc_ref)

    # Global row offset of this chunk inside the per-sample (rows, 128) slab.
    row0 = (pl.program_id(1) * nk + k) * chunk_rows

    def partial_sum(p, t, base_row):
        # p, t: (tb, nch, r, 128) -> (tb, 128) row-sum of squared diff.
        p = p.astype(jnp.float32)
        t = t.astype(jnp.float32)
        if nch == 1:
            diff = p[:, 0] - t[:, 0]
        else:
            diff = coef[0] * (p[:, 0] - t[:, 0])
            for c in range(1, nch):
                diff = diff + coef[c] * (p[:, c] - t[:, c])
        sq = diff * diff                                     # (tb, r, 128)
        if needs_mask:
            ridx = lax.broadcasted_iota(jnp.int32, sq.shape, 1) + base_row
            sq = jnp.where(ridx < rows, sq, 0.0)             # zero tail / OOB rows
        return jnp.sum(sq, axis=1)                           # (tb, 128)

    if slab_rows is None:
        acc_ref[...] += partial_sum(pred_ref[...], target_ref[...], row0)
    else:
        nslab = chunk_rows // slab_rows                      # exact by construction

        def body(i, carry):
            r0 = pl.multiple_of(i * slab_rows, slab_rows)
            p = pred_ref[:, :, pl.ds(r0, slab_rows), :]
            t = target_ref[:, :, pl.ds(r0, slab_rows), :]
            return carry + partial_sum(p, t, row0 + r0)

        carry = lax.fori_loop(0, nslab, body,
                              jnp.zeros(acc_ref.shape, jnp.float32),
                              unroll=True)
        acc_ref[...] += carry                                # one acc write per step

    @pl.when(k == nk - 1)
    def _finalize():
        out_ref[0, 0] = acc_ref[...]


def _choose_tiling(n, nch, rows, row_budget, slab):
    """Pick (tb, chunk_rows, num_k, slab_rows) for a ~4 MiB/input/buffer block."""
    per_sample = nch * rows
    if per_sample <= row_budget:
        # Batch several samples per grid step; one k chunk covers a whole sample.
        tb = max(1, row_budget // per_sample)
        tb = min(tb, n)
        if n >= 2:
            tb = min(tb, -(-n // 2))        # keep nb >= 2 so both v7x cores get work
        chunk_rows = rows
        num_k = 1
        slab_rows = None
    else:
        # Large sample: one sample per block, chunk the row axis.
        tb = 1
        chunk_rows = max(slab, min(_round_down(row_budget // nch, slab),
                                   _round_up(rows, slab)))
        num_k = -(-rows // chunk_rows)
        slab_rows = slab if chunk_rows > slab else None
    return tb, chunk_rows, num_k, slab_rows


@functools.partial(jax.jit, static_argnames=("toY", "_row_budget", "_slab"))
def psnr_loss(pred, target, loss_weight=1.0, toY=False, *,
              _row_budget=_BLOCK_ROW_BUDGET, _slab=_SLAB):
    """Matches basicsr PSNRLoss.forward (reduction='mean')."""
    assert pred.ndim == 4 and target.ndim == 4
    n, c, h, w = pred.shape

    if toY:
        assert c == 3, "toY=True expects 3-channel input"
        nch, d = 3, h * w
        coef = _Y_COEF
    else:
        nch, d = 1, c * h * w
        coef = None

    rows = -(-d // _LANE)
    d_pad = rows * _LANE

    def _prep(x):
        x = x.reshape(n, nch, d)                     # free reshape (contiguous)
        if d_pad != d:
            # TODO(synk): mask the ragged (<128 elem) tail in-kernel instead of
            # this extra HBM round trip (only hit when d % 128 != 0).
            x = jnp.pad(x, ((0, 0), (0, 0), (0, d_pad - d)))
        return x.reshape(n, nch, rows, _LANE)

    p4 = _prep(pred)
    t4 = _prep(target)

    tb, chunk_rows, num_k, slab_rows = _choose_tiling(n, nch, rows,
                                                      _row_budget, _slab)
    nb = -(-n // tb)
    # If there is only one batch block but many chunks (single big image),
    # split the reduction 2-way over a second "parallel" axis so both v7x
    # TensorCores get work; partial sums are combined in the wrapper.
    ksplit = 2 if (nb == 1 and num_k >= 2) else 1
    nk = -(-num_k // ksplit)
    needs_mask = (ksplit * nk * chunk_rows) != rows

    kernel = functools.partial(
        _sqdiff_sum_kernel, nch=nch, coef=coef, rows=rows,
        chunk_rows=chunk_rows, nk=nk, slab_rows=slab_rows, needs_mask=needs_mask)

    # Clamp the chunk index so a fully-out-of-range chunk (odd num_k with
    # ksplit=2) re-reads the last valid chunk; its contribution is masked to
    # zero in-kernel because the mask uses the *logical* row offset.
    def in_idx(b, s, k):
        return (b, 0, jnp.minimum(s * nk + k, num_k - 1), 0)

    in_spec = pl.BlockSpec((tb, nch, chunk_rows, _LANE), in_idx)
    out_spec = pl.BlockSpec((1, 1, tb, _LANE), lambda b, s, k: (b, s, 0, 0))

    partial_sums = pl.pallas_call(
        kernel,
        out_shape=jax.ShapeDtypeStruct((nb, ksplit, tb, _LANE), jnp.float32),
        grid_spec=pltpu.PrefetchScalarGridSpec(
            num_scalar_prefetch=0,
            grid=(nb, ksplit, nk),                  # reduction axis last
            in_specs=[in_spec, in_spec],
            out_specs=out_spec,
            scratch_shapes=[pltpu.VMEM((tb, _LANE), jnp.float32)],
        ),
        compiler_params=pltpu.CompilerParams(
            dimension_semantics=("parallel", "parallel", "arbitrary"),
            vmem_limit_bytes=36 * 1024 * 1024,
        ),
    )(p4, t4)

    # (nb, ksplit, tb, 128) lane/split partial sums -> per-sample sums.
    per_sample = partial_sums.sum(axis=(1, 3)).reshape(-1)[:n]
    mse = per_sample / float(d)
    scale = 10.0 / np.log(10.0)
    return loss_weight * scale * jnp.mean(jnp.log(mse + _EPS))


def _psnr_loss_ref(pred, target, loss_weight=1.0, toY=False):
    if toY:
        coef = jnp.array([65.481, 128.553, 24.966], jnp.float32).reshape(1, 3, 1, 1)
        pred = (pred * coef).sum(axis=1, keepdims=True) + 16.0
        target = (target * coef).sum(axis=1, keepdims=True) + 16.0
        pred, target = pred / 255.0, target / 255.0
    scale = 10.0 / np.log(10.0)
    mse = jnp.mean((pred - target) ** 2, axis=(1, 2, 3))
    return loss_weight * scale * jnp.mean(jnp.log(mse + 1e-8))


if __name__ == "__main__":
    key = jax.random.PRNGKey(0)
    k1, k2, k3, k4, k5, k6 = jax.random.split(key, 6)

    # 1) Main check: aligned shape (d = 1024, multiple of 128), toY=False.
    pred = jax.random.uniform(k1, (2, 4, 16, 16), dtype=jnp.float32)
    target = jax.random.uniform(k2, (2, 4, 16, 16), dtype=jnp.float32)
    out = jax.block_until_ready(psnr_loss(pred, target, loss_weight=1.0, toY=False))
    ref = _psnr_loss_ref(pred, target, loss_weight=1.0, toY=False)
    np.testing.assert_allclose(np.asarray(out), np.asarray(ref), rtol=1e-4, atol=1e-5)

    # 2) Ragged spatial size + fused toY path (and a partial batch block).
    pred2 = jax.random.uniform(k3, (3, 3, 10, 11), dtype=jnp.float32)
    target2 = jax.random.uniform(k4, (3, 3, 10, 11), dtype=jnp.float32)
    out2 = jax.block_until_ready(psnr_loss(pred2, target2, loss_weight=0.5, toY=True))
    ref2 = _psnr_loss_ref(pred2, target2, loss_weight=0.5, toY=True)
    np.testing.assert_allclose(np.asarray(out2), np.asarray(ref2), rtol=1e-4, atol=1e-5)

    # 3) Exercise the multi-chunk / split-k / tail-mask / slab-loop machinery
    #    on a tiny array by shrinking the internal budgets.
    pred3 = jax.random.uniform(k5, (1, 1, 40, 128), dtype=jnp.float32)
    target3 = jax.random.uniform(k6, (1, 1, 40, 128), dtype=jnp.float32)
    out3 = jax.block_until_ready(
        psnr_loss(pred3, target3, loss_weight=1.0, toY=False,
                  _row_budget=16, _slab=8))
    ref3 = _psnr_loss_ref(pred3, target3, loss_weight=1.0, toY=False)
    np.testing.assert_allclose(np.asarray(out3), np.asarray(ref3), rtol=1e-4, atol=1e-5)

    print("KERNEL_OK")
</pallas_src>

<mosaic_0001>
module attributes {stable_mosaic.version = 11 : i64} {
  func.func @_sqdiff_sum_kernel(%arg0: i32, %arg1: i32, %arg2: i32, %arg3: memref<1x1x8x128xf32, #tpu.memory_space<vmem>>, %arg4: memref<1x1x8x128xf32, #tpu.memory_space<vmem>>, %arg5: memref<1x1x1x128xf32, #tpu.memory_space<vmem>>, %arg6: memref<1x128xf32, #tpu.memory_space<vmem>>) attributes {dimension_semantics = [#tpu.dimension_semantics<parallel>, #tpu.dimension_semantics<parallel>, #tpu.dimension_semantics<arbitrary>], iteration_bounds = array<i64: 2, 1, 1>, scalar_prefetch = 0 : i64, scratch_operands = 1 : i64, tpu.core_type = #tpu.core_type<tc>, window_params = [{transform_indices = @transform_0, window_bounds = array<i64: 1, 1, 8, 128>}, {transform_indices = @transform_1, window_bounds = array<i64: 1, 1, 8, 128>}, {transform_indices = @transform_2, window_bounds = array<i64: 1, 1, 1, 128>}]} {
    %c0_i32 = arith.constant 0 : i32
    %0 = arith.cmpi eq, %arg2, %c0_i32 : i32
    %1 = arith.extui %0 : i1 to i32
    %c0_i32_0 = arith.constant 0 : i32
    %2 = arith.cmpi ne, %1, %c0_i32_0 : i32
    scf.if %2 {
      %cst_14 = arith.constant 0.000000e+00 : f32
      %16 = vector.broadcast %cst_14 : f32 to vector<1x128xf32>
      %c0_15 = arith.constant 0 : index
      %c0_16 = arith.constant 0 : index
      %17 = vector.load %arg6[%c0_15, %c0_16] : memref<1x128xf32, #tpu.memory_space<vmem>>, vector<1x128xf32>
      tpu.vector_store %arg6[%c0_15, %c0_16], %16 {strides = array<i32>} : memref<1x128xf32, #tpu.memory_space<vmem>>, vector<1x128xf32>,
    } else {
    }
    %c0 = arith.constant 0 : index
    %c0_1 = arith.constant 0 : index
    %3 = vector.load %arg6[%c0, %c0_1] : memref<1x128xf32, #tpu.memory_space<vmem>>, vector<1x128xf32>
    %c0_2 = arith.constant 0 : index
    %c0_3 = arith.constant 0 : index
    %c0_4 = arith.constant 0 : index
    %c0_5 = arith.constant 0 : index
    %4 = vector.load %arg3[%c0_2, %c0_3, %c0_4, %c0_5] : memref<1x1x8x128xf32, #tpu.memory_space<vmem>>, vector<1x1x8x128xf32>
    %c0_6 = arith.constant 0 : index
    %c0_7 = arith.constant 0 : index
    %c0_8 = arith.constant 0 : index
    %c0_9 = arith.constant 0 : index
    %5 = vector.load %arg4[%c0_6, %c0_7, %c0_8, %c0_9] : memref<1x1x8x128xf32, #tpu.memory_space<vmem>>, vector<1x1x8x128xf32>
    %6 = vector.shape_cast %4 : vector<1x1x8x128xf32> to vector<1x8x128xf32>
    %7 = vector.shape_cast %5 : vector<1x1x8x128xf32> to vector<1x8x128xf32>
    %8 = arith.subf %6, %7 : vector<1x8x128xf32>
    %9 = arith.mulf %8, %8 : vector<1x8x128xf32>
    %cst = arith.constant dense<0.000000e+00> : vector<1x128xf32>
    %10 = vector.multi_reduction <add>, %9, %cst [1] : vector<1x8x128xf32> to vector<1x128xf32>
    %11 = arith.addf %3, %10 : vector<1x128xf32>
    %c0_10 = arith.constant 0 : index
    %c0_11 = arith.constant 0 : index
    %12 = vector.load %arg6[%c0_10, %c0_11] : memref<1x128xf32, #tpu.memory_space<vmem>>, vector<1x128xf32>
    tpu.vector_store %arg6[%c0_10, %c0_11], %11 {strides = array<i32>} : memref<1x128xf32, #tpu.memory_space<vmem>>, vector<1x128xf32>,
    %c0_i32_12 = arith.constant 0 : i32
    %13 = arith.cmpi eq, %arg2, %c0_i32_12 : i32
    %14 = arith.extui %13 : i1 to i32
    %c0_i32_13 = arith.constant 0 : i32
    %15 = arith.cmpi ne, %14, %c0_i32_13 : i32
    scf.if %15 {
      %c0_14 = arith.constant 0 : index
      %c0_15 = arith.constant 0 : index
      %16 = vector.load %arg6[%c0_14, %c0_15] : memref<1x128xf32, #tpu.memory_space<vmem>>, vector<1x128xf32>
      %c0_16 = arith.constant 0 : index
      %c0_17 = arith.constant 0 : index
      %c0_18 = arith.constant 0 : index
      %c0_19 = arith.constant 0 : index
      %17 = vector.load %arg5[%c0_16, %c0_17, %c0_18, %c0_19] : memref<1x1x1x128xf32, #tpu.memory_space<vmem>>, vector<1x1x1x128xf32>
      %18 = vector.shape_cast %17 : vector<1x1x1x128xf32> to vector<1x128xf32>
      %19 = vector.shape_cast %16 : vector<1x128xf32> to vector<1x1x1x128xf32>
      tpu.vector_store %arg5[%c0_16, %c0_17, %c0_18, %c0_19], %19 {strides = array<i32>} : memref<1x1x1x128xf32, #tpu.memory_space<vmem>>, vector<1x1x1x128xf32>,
    } else {
    }
    return
  }
  func.func @transform_0(%arg0: i32, %arg1: i32, %arg2: i32) -> (i32, i32, i32, i32) {
    %c1_i32 = arith.constant 1 : i32
    %0 = arith.muli %arg1, %c1_i32 : i32
    %1 = arith.addi %0, %arg2 : i32
    %c0_i32 = arith.constant 0 : i32
    %2 = arith.minsi %1, %c0_i32 : i32
    %c0_i32_0 = arith.constant 0 : i32
    %c0_i32_1 = arith.constant 0 : i32
    %c0_i32_2 = arith.constant 0 : i32
    return %arg0, %c0_i32_0, %2, %c0_i32_1 : i32, i32, i32, i32
  }
  func.func @transform_1(%arg0: i32, %arg1: i32, %arg2: i32) -> (i32, i32, i32, i32) {
    %c1_i32 = arith.constant 1 : i32
    %0 = arith.muli %arg1, %c1_i32 : i32
    %1 = arith.addi %0, %arg2 : i32
    %c0_i32 = arith.constant 0 : i32
    %2 = arith.minsi %1, %c0_i32 : i32
    %c0_i32_0 = arith.constant 0 : i32
    %c0_i32_1 = arith.constant 0 : i32
    %c0_i32_2 = arith.constant 0 : i32
    return %arg0, %c0_i32_0, %2, %c0_i32_1 : i32, i32, i32, i32
  }
  func.func @transform_2(%arg0: i32, %arg1: i32, %arg2: i32) -> (i32, i32, i32, i32) {
    %c0_i32 = arith.constant 0 : i32
    %c0_i32_0 = arith.constant 0 : i32
    %c0_i32_1 = arith.constant 0 : i32
    return %arg0, %arg1, %c0_i32, %c0_i32_0 : i32, i32, i32, i32
  }
}

</mosaic_0001>

<bundles_post_ra>
// kernel: psnr_loss.1
= control target key start
LH: loop header
LB: loop body
LE: loop exit
PB: predicated region body
PF: predicated region fallthrough
CT: control target
= control target key end

     0   :  { %s428_s9 = smov 0   ;;  %s430_s10 = smov 0   ;;  %s464_s0 = inlined_call_operand.vmem [shape: f32[2,1,8,128], index: 0, kind: input, shape index: {}]   ;;  %s465_s1 = inlined_call_operand.vmem [shape: f32[2,1,8,128], index: 1, kind: input, shape index: {}]   ;;  %s466_s2 = inlined_call_operand.vmem [shape: f32[2,1,1,128], index: 2, kind: output, shape index: {}]  }
   0x1   :  { %s432_s11 = smov 0  }
   0x2 LB: > { %s31_s12 = sadd.s32 1, %s406_s10  ;;  %p358_p0 = scmp.ge.s32.totalorder %s410_s11, 1  ;;  %s410_s11 = sphi %s432_s11, %s12_s11   ;;  %s406_s10 = sphi %s430_s10, %s468_s10   ;;  %s402_s9 = sphi %s428_s9, %s467_s9  }
   0x3   : > { %p33_p1 = scmp.ge.s32.totalorder %s31_s12, 2  ;;  %p175_p2 = scmp.lt.s32.totalorder %s410_s11, 3 }
   0x5   : > { %s470_s12 = smov (%p33_p1, %s31_s12), 0  ;;  %p176_p3 = pnand %p358_p0, %p175_p2 }
   0x6   : > { %p216_p4 = scmp.lt.s32.totalorder (!%p176_p3), %s402_s9, 1 }
   0x7   : > { %179 = sbr.rel (%p176_p3) target bundleno = 44 (0x2c), region = 28 }
   0xc   : > { %v412_v0 = vmov 0.0   ;;  %s472_s9 = smov (!%p216_p4, %s402_s9), 1 }
   0xd   : > { %249 = vst [vmem:[#allocation2] sm:$0x1] %v412_v0  ;;  %s359_s13 = sshll.u32 %s472_s9, 3  ;;  %s244_s22 = scalar_lea.vmem %s466_s2, %s472_s9 }
   0xe   : > { %s222_s16 = scalar_lea.vmem %s464_s0, %s359_s13  ;;  %s235_s19 = scalar_lea.vmem %s465_s1, %s359_s13 }
   0xf   : > { %v251_v1 = vld [vmem:[%s222_s16] sm:$0xff] }
  0x10   : > { %v252_v2 = vld [vmem:[%s235_s19] sm:$0xff] }
  0x11   : > { %v253_v3 = vsub.f32 %v251_v1, %v252_v2 }
  0x13   : > { %v254_v4 = vmul.f32 %v253_v3, %v253_v3 }
  0x14   : > { %v250_v10 = vld [vmem:[#allocation2] sm:$0x1] }
  0x15   : > { %v255_v5 = vrot.slane %v254_v4, 4 }
  0x17   : > { %v256_v6 = vadd.f32 %v255_v5, %v254_v4 }
  0x19   : > { %v257_v7 = vrot.slane %v256_v6, 2 }
  0x1b   : > { %v258_v8 = vadd.f32 %v257_v7, %v256_v6 }
  0x1d   : > { %v259_v9 = vrot.slane %v258_v8, 1 }
  0x1f   : > { %v260_v11 = vadd.f32 %v259_v9, %v258_v8 }
  0x21   : > { %v261_v12 = vadd.f32 %v260_v11, %v250_v10 }
  0x23   : > { %262 = vst [vmem:[#allocation2] sm:$0x1] %v261_v12 }
  0x2a   : > { %v266_v13 = vld [vmem:[#allocation2] sm:$0x1] }
  0x2b   : > { %267 = vst [vmem:[%s244_s22] sm:$0x1] %v266_v13 }
  0x2c PF: > { %s12_s11 = sadd.s32 1, %s410_s11   ;;  %s467_s9 = smov %s406_s10 }
  0x2d   : > { %p9_p5 = scmp.ge.s32.totalorder %s12_s11, 4   ;;  %s468_s10 = smov %s470_s12 }
  0x2f   :  { %11 = sbr.rel (!%p9_p5) target bundleno = 2 (0x2), region = 69 }

</bundles_post_ra>
